<compile_context>
chip_gen: v7x
topology: tpu7x:2x2x1
jax: 0.10.0
libtpu: 0.0.40
codegen_flags: <defaults>
</compile_context>

<pallas_src>
import jax
import jax.numpy as jnp
from jax import lax
from jax.experimental import pallas as pl
from jax.experimental.pallas import tpu as pltpu


def _make_residual_block_kernel(W, Cp, LW):
    """Kernel over one grid step: (Cp, LW) image slab, LW = B*H*W lanes."""

    def kernel(x_ref, w1_ref, b1_ref, w2_ref, b2_ref, mask_ref, out_ref,
               patch_ref):
        # x_ref   : (1, Cp, LW)   channels in sublanes, batched spatial in lanes
        # w*_ref  : (Cp, 9*Cp)    im2col weights, col = (kh*3+kw)*Cp + c_in
        # b*_ref  : (Cp, 1)
        # mask_ref: (9, LW)       precomputed 0/1 zero-padding masks per tap
        # out_ref : (1, Cp, LW)
        # patch_ref (scratch): (9*Cp, LW) im2col patch in VMEM
        x = x_ref[0].astype(jnp.float32)                       # (Cp, LW)

        def build_patch(src):
            # 3x3 halo via lane roll + hoisted boundary mask; zero-padding conv.
            for kh in range(3):
                dh = kh - 1
                for kw in range(3):
                    dw = kw - 1
                    t = kh * 3 + kw
                    if dh == 0 and dw == 0:
                        tap = src                              # center: no roll/mask
                    else:
                        shift = (-(dh * W + dw)) % LW
                        shifted = pltpu.roll(src, shift=shift, axis=1)
                        tap = shifted * mask_ref[pl.ds(t, 1), :]
                    patch_ref[pl.ds(t * Cp, Cp), :] = tap      # tile-aligned store

        def conv3x3(w_ref, b_ref):
            # one lane-dense MXU GEMM per conv: (Cp, 9Cp) @ (9Cp, LW) -> (Cp, LW)
            return jnp.dot(w_ref[...], patch_ref[...],
                           preferred_element_type=jnp.float32) + b_ref[...]

        build_patch(x)
        h1 = jnp.maximum(conv3x3(w1_ref, b1_ref), 0.0)         # conv1 + ReLU
        build_patch(h1)
        out = conv3x3(w2_ref, b2_ref) + x                      # conv2 + residual
        out_ref[0] = out.astype(out_ref.dtype)

    return kernel


def residual_block(x_nchw, w1, b1, w2, b2, images_per_step=None):
    """x_nchw: (N, C, H, W); w*: (C, C, 3, 3) PyTorch OIHW; b*: (C,)."""
    N, C, H, W = x_nchw.shape
    HW = H * W
    Cp = max(8, ((C + 7) // 8) * 8)            # pad channels to sublane tile

    if images_per_step is None:
        # Keep exactly 2 grid steps when possible (one per v7x TensorCore);
        # otherwise fold everything into a single step.
        images_per_step = N // 2 if (N % 2 == 0 and N >= 2) else N
    assert N % images_per_step == 0, "images_per_step must divide N"
    B = images_per_step
    steps = N // B
    LW = B * HW                                 # lane width per grid step

    # --- layout prep (all tiny, one-time HBM work) -------------------------
    # (N,C,HW) -> (steps, C, B*HW): B images batched along the lane axis.
    x_lanes = (x_nchw.reshape(steps, B, C, HW)
               .transpose(0, 2, 1, 3)
               .reshape(steps, C, LW))
    x_lanes = jnp.pad(x_lanes, ((0, 0), (0, Cp - C), (0, 0)))  # (steps, Cp, LW)

    def prep_w(w):
        # OIHW -> (Cp_out, 9*Cp_in), taps (kh,kw)-major, c_in-minor, zero-padded.
        wt = jnp.transpose(w, (0, 2, 3, 1))                    # (O, 3, 3, I)
        wt = jnp.pad(wt, ((0, Cp - C), (0, 0), (0, 0), (0, Cp - C)))
        return wt.reshape(Cp, 9 * Cp).astype(jnp.float32)

    w1m, w2m = prep_w(w1), prep_w(w2)
    b1c = jnp.pad(b1.astype(jnp.float32), (0, Cp - C)).reshape(Cp, 1)
    b2c = jnp.pad(b2.astype(jnp.float32), (0, Cp - C)).reshape(Cp, 1)

    # Hoisted zero-padding masks per tap (also zero the cross-image roll wrap).
    lane = jnp.arange(LW)
    pos = lane % HW
    h_idx = pos // W
    w_idx = pos % W
    mask_rows = []
    for kh in range(3):
        dh = kh - 1
        for kw in range(3):
            dw = kw - 1
            ok = ((h_idx + dh >= 0) & (h_idx + dh < H) &
                  (w_idx + dw >= 0) & (w_idx + dw < W))
            mask_rows.append(ok.astype(jnp.float32))
    mask = jnp.stack(mask_rows, axis=0)                        # (9, LW)

    # --- pallas call --------------------------------------------------------
    kernel = _make_residual_block_kernel(W, Cp, LW)
    out_flat = pl.pallas_call(
        kernel,
        out_shape=jax.ShapeDtypeStruct((steps, Cp, LW), x_nchw.dtype),
        grid_spec=pltpu.PrefetchScalarGridSpec(
            num_scalar_prefetch=0,
            grid=(steps,),
            in_specs=[
                pl.BlockSpec((1, Cp, LW), lambda s: (s, 0, 0)),
                pl.BlockSpec((Cp, 9 * Cp), lambda s: (0, 0)),
                pl.BlockSpec((Cp, 1), lambda s: (0, 0)),
                pl.BlockSpec((Cp, 9 * Cp), lambda s: (0, 0)),
                pl.BlockSpec((Cp, 1), lambda s: (0, 0)),
                pl.BlockSpec((9, LW), lambda s: (0, 0)),
            ],
            out_specs=pl.BlockSpec((1, Cp, LW), lambda s: (s, 0, 0)),
            scratch_shapes=[pltpu.VMEM((9 * Cp, LW), jnp.float32)],
        ),
        compiler_params=pltpu.CompilerParams(
            dimension_semantics=("parallel",)),
    )(x_lanes, w1m, b1c, w2m, b2c, mask)

    # Drop channel padding, undo lane batching.
    out = out_flat[:, :C, :]
    out = out.reshape(steps, C, B, HW).transpose(0, 2, 1, 3)
    return out.reshape(N, C, H, W)


def _reference(x_nchw, w1, b1, w2, b2):
    # Pure-JAX reference matching PyTorch Conv2d(k=3, s=1, p=1) semantics.
    def conv(x, w, b):
        y = lax.conv_general_dilated(
            x, w, window_strides=(1, 1), padding=((1, 1), (1, 1)),
            dimension_numbers=("NCHW", "OIHW", "NCHW"))
        return y + b[None, :, None, None]

    h = jnp.maximum(conv(x_nchw, w1, b1), 0.0)
    return conv(h, w2, b2) + x_nchw


if __name__ == "__main__":
    N, C, H, W = 2, 4, 16, 16
    key = jax.random.PRNGKey(0)
    kx, kw1, kb1, kw2, kb2 = jax.random.split(key, 5)

    x = jax.random.normal(kx, (N, C, H, W), dtype=jnp.float32)
    # Deterministic synthetic parameters (Conv2d(in=C, out=C, k=3) shapes).
    w1 = jax.random.normal(kw1, (C, C, 3, 3), dtype=jnp.float32) * 0.1
    b1 = jax.random.normal(kb1, (C,), dtype=jnp.float32) * 0.1
    w2 = jax.random.normal(kw2, (C, C, 3, 3), dtype=jnp.float32) * 0.1
    b2 = jax.random.normal(kb2, (C,), dtype=jnp.float32) * 0.1

    out = residual_block(x, w1, b1, w2, b2)
    out = jax.block_until_ready(out)

    ref = jax.block_until_ready(_reference(x, w1, b1, w2, b2))
    assert out.shape == ref.shape == (N, C, H, W)
    assert jnp.allclose(out, ref, rtol=1e-4, atol=1e-4), (
        float(jnp.max(jnp.abs(out - ref))))

    print("KERNEL_OK")
</pallas_src>

<mosaic_0001>
module attributes {stable_mosaic.version = 11 : i64} {
  func.func @kernel(%arg0: i32, %arg1: memref<1x8x256xf32, #tpu.memory_space<vmem>>, %arg2: memref<8x72xf32, #tpu.memory_space<vmem>>, %arg3: memref<8x1xf32, #tpu.memory_space<vmem>>, %arg4: memref<8x72xf32, #tpu.memory_space<vmem>>, %arg5: memref<8x1xf32, #tpu.memory_space<vmem>>, %arg6: memref<9x256xf32, #tpu.memory_space<vmem>>, %arg7: memref<1x8x256xf32, #tpu.memory_space<vmem>>, %arg8: memref<72x256xf32, #tpu.memory_space<vmem>>) attributes {dimension_semantics = [#tpu.dimension_semantics<parallel>], iteration_bounds = array<i64: 2>, scalar_prefetch = 0 : i64, scratch_operands = 1 : i64, tpu.core_type = #tpu.core_type<tc>, window_params = [{transform_indices = @transform_0, window_bounds = array<i64: 1, 8, 256>}, {pipeline_mode = #tpu.pipeline_mode<synchronous>, transform_indices = @transform_1, window_bounds = array<i64: 8, 72>}, {pipeline_mode = #tpu.pipeline_mode<synchronous>, transform_indices = @transform_2, window_bounds = array<i64: 8, 1>}, {pipeline_mode = #tpu.pipeline_mode<synchronous>, transform_indices = @transform_3, window_bounds = array<i64: 8, 72>}, {pipeline_mode = #tpu.pipeline_mode<synchronous>, transform_indices = @transform_4, window_bounds = array<i64: 8, 1>}, {pipeline_mode = #tpu.pipeline_mode<synchronous>, transform_indices = @transform_5, window_bounds = array<i64: 9, 256>}, {transform_indices = @transform_6, window_bounds = array<i64: 1, 8, 256>}]} {
    %c0 = arith.constant 0 : index
    %c0_0 = arith.constant 0 : index
    %c0_1 = arith.constant 0 : index
    %0 = vector.load %arg1[%c0, %c0_0, %c0_1] : memref<1x8x256xf32, #tpu.memory_space<vmem>>, vector<1x8x256xf32>
    %1 = vector.shape_cast %0 : vector<1x8x256xf32> to vector<8x256xf32>
    %c17_i32 = arith.constant 17 : i32
    %2 = tpu.dynamic_rotate %1 by %c17_i32 dim 1 : vector<8x256xf32>, i32 -> vector<8x256xf32>
    %c0_2 = arith.constant 0 : index
    %c0_3 = arith.constant 0 : index
    %3 = vector.load %arg6[%c0_2, %c0_3] : memref<9x256xf32, #tpu.memory_space<vmem>>, vector<1x256xf32>
    %4 = vector.broadcast %3 : vector<1x256xf32> to vector<8x256xf32>
    %5 = arith.mulf %2, %4 : vector<8x256xf32>
    %c0_4 = arith.constant 0 : index
    %c0_5 = arith.constant 0 : index
    %6 = vector.load %arg8[%c0_4, %c0_5] : memref<72x256xf32, #tpu.memory_space<vmem>>, vector<8x256xf32>
    tpu.vector_store %arg8[%c0_4, %c0_5], %5 {strides = array<i32>} : memref<72x256xf32, #tpu.memory_space<vmem>>, vector<8x256xf32>,
    %c16_i32 = arith.constant 16 : i32
    %7 = tpu.dynamic_rotate %1 by %c16_i32 dim 1 : vector<8x256xf32>, i32 -> vector<8x256xf32>
    %c1 = arith.constant 1 : index
    %c0_6 = arith.constant 0 : index
    %8 = vector.load %arg6[%c1, %c0_6] : memref<9x256xf32, #tpu.memory_space<vmem>>, vector<1x256xf32>
    %9 = vector.broadcast %8 : vector<1x256xf32> to vector<8x256xf32>
    %10 = arith.mulf %7, %9 : vector<8x256xf32>
    %c8 = arith.constant 8 : index
    %c0_7 = arith.constant 0 : index
    %11 = vector.load %arg8[%c8, %c0_7] : memref<72x256xf32, #tpu.memory_space<vmem>>, vector<8x256xf32>
    tpu.vector_store %arg8[%c8, %c0_7], %10 {strides = array<i32>} : memref<72x256xf32, #tpu.memory_space<vmem>>, vector<8x256xf32>,
    %c15_i32 = arith.constant 15 : i32
    %12 = tpu.dynamic_rotate %1 by %c15_i32 dim 1 : vector<8x256xf32>, i32 -> vector<8x256xf32>
    %c2 = arith.constant 2 : index
    %c0_8 = arith.constant 0 : index
    %13 = vector.load %arg6[%c2, %c0_8] : memref<9x256xf32, #tpu.memory_space<vmem>>, vector<1x256xf32>
    %14 = vector.broadcast %13 : vector<1x256xf32> to vector<8x256xf32>
    %15 = arith.mulf %12, %14 : vector<8x256xf32>
    %c16 = arith.constant 16 : index
    %c0_9 = arith.constant 0 : index
    %16 = vector.load %arg8[%c16, %c0_9] : memref<72x256xf32, #tpu.memory_space<vmem>>, vector<8x256xf32>
    tpu.vector_store %arg8[%c16, %c0_9], %15 {strides = array<i32>} : memref<72x256xf32, #tpu.memory_space<vmem>>, vector<8x256xf32>,
    %c1_i32 = arith.constant 1 : i32
    %17 = tpu.dynamic_rotate %1 by %c1_i32 dim 1 : vector<8x256xf32>, i32 -> vector<8x256xf32>
    %c3 = arith.constant 3 : index
    %c0_10 = arith.constant 0 : index
    %18 = vector.load %arg6[%c3, %c0_10] : memref<9x256xf32, #tpu.memory_space<vmem>>, vector<1x256xf32>
    %19 = vector.broadcast %18 : vector<1x256xf32> to vector<8x256xf32>
    %20 = arith.mulf %17, %19 : vector<8x256xf32>
    %c24 = arith.constant 24 : index
    %c0_11 = arith.constant 0 : index
    %21 = vector.load %arg8[%c24, %c0_11] : memref<72x256xf32, #tpu.memory_space<vmem>>, vector<8x256xf32>
    tpu.vector_store %arg8[%c24, %c0_11], %20 {strides = array<i32>} : memref<72x256xf32, #tpu.memory_space<vmem>>, vector<8x256xf32>,
    %c32 = arith.constant 32 : index
    %c0_12 = arith.constant 0 : index
    %22 = vector.load %arg8[%c32, %c0_12] : memref<72x256xf32, #tpu.memory_space<vmem>>, vector<8x256xf32>
    tpu.vector_store %arg8[%c32, %c0_12], %1 {strides = array<i32>} : memref<72x256xf32, #tpu.memory_space<vmem>>, vector<8x256xf32>,
    %c255_i32 = arith.constant 255 : i32
    %23 = tpu.dynamic_rotate %1 by %c255_i32 dim 1 : vector<8x256xf32>, i32 -> vector<8x256xf32>
    %c5 = arith.constant 5 : index
    %c0_13 = arith.constant 0 : index
    %24 = vector.load %arg6[%c5, %c0_13] : memref<9x256xf32, #tpu.memory_space<vmem>>, vector<1x256xf32>
    %25 = vector.broadcast %24 : vector<1x256xf32> to vector<8x256xf32>
    %26 = arith.mulf %23, %25 : vector<8x256xf32>
    %c40 = arith.constant 40 : index
    %c0_14 = arith.constant 0 : index
    %27 = vector.load %arg8[%c40, %c0_14] : memref<72x256xf32, #tpu.memory_space<vmem>>, vector<8x256xf32>
    tpu.vector_store %arg8[%c40, %c0_14], %26 {strides = array<i32>} : memref<72x256xf32, #tpu.memory_space<vmem>>, vector<8x256xf32>,
    %c241_i32 = arith.constant 241 : i32
    %28 = tpu.dynamic_rotate %1 by %c241_i32 dim 1 : vector<8x256xf32>, i32 -> vector<8x256xf32>
    %c6 = arith.constant 6 : index
    %c0_15 = arith.constant 0 : index
    %29 = vector.load %arg6[%c6, %c0_15] : memref<9x256xf32, #tpu.memory_space<vmem>>, vector<1x256xf32>
    %30 = vector.broadcast %29 : vector<1x256xf32> to vector<8x256xf32>
    %31 = arith.mulf %28, %30 : vector<8x256xf32>
    %c48 = arith.constant 48 : index
    %c0_16 = arith.constant 0 : index
    %32 = vector.load %arg8[%c48, %c0_16] : memref<72x256xf32, #tpu.memory_space<vmem>>, vector<8x256xf32>
    tpu.vector_store %arg8[%c48, %c0_16], %31 {strides = array<i32>} : memref<72x256xf32, #tpu.memory_space<vmem>>, vector<8x256xf32>,
    %c240_i32 = arith.constant 240 : i32
    %33 = tpu.dynamic_rotate %1 by %c240_i32 dim 1 : vector<8x256xf32>, i32 -> vector<8x256xf32>
    %c7 = arith.constant 7 : index
    %c0_17 = arith.constant 0 : index
    %34 = vector.load %arg6[%c7, %c0_17] : memref<9x256xf32, #tpu.memory_space<vmem>>, vector<1x256xf32>
    %35 = vector.broadcast %34 : vector<1x256xf32> to vector<8x256xf32>
    %36 = arith.mulf %33, %35 : vector<8x256xf32>
    %c56 = arith.constant 56 : index
    %c0_18 = arith.constant 0 : index
    %37 = vector.load %arg8[%c56, %c0_18] : memref<72x256xf32, #tpu.memory_space<vmem>>, vector<8x256xf32>
    tpu.vector_store %arg8[%c56, %c0_18], %36 {strides = array<i32>} : memref<72x256xf32, #tpu.memory_space<vmem>>, vector<8x256xf32>,
    %c239_i32 = arith.constant 239 : i32
    %38 = tpu.dynamic_rotate %1 by %c239_i32 dim 1 : vector<8x256xf32>, i32 -> vector<8x256xf32>
    %c8_19 = arith.constant 8 : index
    %c0_20 = arith.constant 0 : index
    %39 = vector.load %arg6[%c8_19, %c0_20] : memref<9x256xf32, #tpu.memory_space<vmem>>, vector<1x256xf32>
    %40 = vector.broadcast %39 : vector<1x256xf32> to vector<8x256xf32>
    %41 = arith.mulf %38, %40 : vector<8x256xf32>
    %c64 = arith.constant 64 : index
    %c0_21 = arith.constant 0 : index
    %42 = vector.load %arg8[%c64, %c0_21] : memref<72x256xf32, #tpu.memory_space<vmem>>, vector<8x256xf32>
    tpu.vector_store %arg8[%c64, %c0_21], %41 {strides = array<i32>} : memref<72x256xf32, #tpu.memory_space<vmem>>, vector<8x256xf32>,
    %c0_22 = arith.constant 0 : index
    %c0_23 = arith.constant 0 : index
    %43 = vector.load %arg2[%c0_22, %c0_23] : memref<8x72xf32, #tpu.memory_space<vmem>>, vector<8x72xf32>
    %c0_24 = arith.constant 0 : index
    %c0_25 = arith.constant 0 : index
    %44 = vector.load %arg8[%c0_24, %c0_25] : memref<72x256xf32, #tpu.memory_space<vmem>>, vector<72x256xf32>
    %cst = arith.constant dense<0.000000e+00> : vector<8x256xf32>
    %45 = tpu.matmul %43, %44, %cst {dimension_numbers = #tpu.dot_dimension_numbers<[1], [0], [0], [1], [0, 0, 1, 1], [], []>} : vector<8x72xf32>, vector<72x256xf32>, vector<8x256xf32> -> vector<8x256xf32>
    %c0_26 = arith.constant 0 : index
    %c0_27 = arith.constant 0 : index
    %46 = vector.load %arg3[%c0_26, %c0_27] : memref<8x1xf32, #tpu.memory_space<vmem>>, vector<8x1xf32>
    %47 = vector.broadcast %46 : vector<8x1xf32> to vector<8x256xf32>
    %48 = arith.addf %45, %47 : vector<8x256xf32>
    %cst_28 = arith.constant 0.000000e+00 : f32
    %49 = vector.broadcast %cst_28 : f32 to vector<8x256xf32>
    %50 = arith.maximumf %48, %49 : vector<8x256xf32>
    %c17_i32_29 = arith.constant 17 : i32
    %51 = tpu.dynamic_rotate %50 by %c17_i32_29 dim 1 : vector<8x256xf32>, i32 -> vector<8x256xf32>
    %c0_30 = arith.constant 0 : index
    %c0_31 = arith.constant 0 : index
    %52 = vector.load %arg6[%c0_30, %c0_31] : memref<9x256xf32, #tpu.memory_space<vmem>>, vector<1x256xf32>
    %53 = vector.broadcast %52 : vector<1x256xf32> to vector<8x256xf32>
    %54 = arith.mulf %51, %53 : vector<8x256xf32>
    %c0_32 = arith.constant 0 : index
    %c0_33 = arith.constant 0 : index
    %55 = vector.load %arg8[%c0_32, %c0_33] : memref<72x256xf32, #tpu.memory_space<vmem>>, vector<8x256xf32>
    tpu.vector_store %arg8[%c0_32, %c0_33], %54 {strides = array<i32>} : memref<72x256xf32, #tpu.memory_space<vmem>>, vector<8x256xf32>,
    %c16_i32_34 = arith.constant 16 : i32
    %56 = tpu.dynamic_rotate %50 by %c16_i32_34 dim 1 : vector<8x256xf32>, i32 -> vector<8x256xf32>
    %c1_35 = arith.constant 1 : index
    %c0_36 = arith.constant 0 : index
    %57 = vector.load %arg6[%c1_35, %c0_36] : memref<9x256xf32, #tpu.memory_space<vmem>>, vector<1x256xf32>
    %58 = vector.broadcast %57 : vector<1x256xf32> to vector<8x256xf32>
    %59 = arith.mulf %56, %58 : vector<8x256xf32>
    %c8_37 = arith.constant 8 : index
    %c0_38 = arith.constant 0 : index
    %60 = vector.load %arg8[%c8_37, %c0_38] : memref<72x256xf32, #tpu.memory_space<vmem>>, vector<8x256xf32>
    tpu.vector_store %arg8[%c8_37, %c0_38], %59 {strides = array<i32>} : memref<72x256xf32, #tpu.memory_space<vmem>>, vector<8x256xf32>,
    %c15_i32_39 = arith.constant 15 : i32
    %61 = tpu.dynamic_rotate %50 by %c15_i32_39 dim 1 : vector<8x256xf32>, i32 -> vector<8x256xf32>
    %c2_40 = arith.constant 2 : index
    %c0_41 = arith.constant 0 : index
    %62 = vector.load %arg6[%c2_40, %c0_41] : memref<9x256xf32, #tpu.memory_space<vmem>>, vector<1x256xf32>
    %63 = vector.broadcast %62 : vector<1x256xf32> to vector<8x256xf32>
    %64 = arith.mulf %61, %63 : vector<8x256xf32>
    %c16_42 = arith.constant 16 : index
    %c0_43 = arith.constant 0 : index
    %65 = vector.load %arg8[%c16_42, %c0_43] : memref<72x256xf32, #tpu.memory_space<vmem>>, vector<8x256xf32>
    tpu.vector_store %arg8[%c16_42, %c0_43], %64 {strides = array<i32>} : memref<72x256xf32, #tpu.memory_space<vmem>>, vector<8x256xf32>,
    %c1_i32_44 = arith.constant 1 : i32
    %66 = tpu.dynamic_rotate %50 by %c1_i32_44 dim 1 : vector<8x256xf32>, i32 -> vector<8x256xf32>
    %c3_45 = arith.constant 3 : index
    %c0_46 = arith.constant 0 : index
    %67 = vector.load %arg6[%c3_45, %c0_46] : memref<9x256xf32, #tpu.memory_space<vmem>>, vector<1x256xf32>
    %68 = vector.broadcast %67 : vector<1x256xf32> to vector<8x256xf32>
    %69 = arith.mulf %66, %68 : vector<8x256xf32>
    %c24_47 = arith.constant 24 : index
    %c0_48 = arith.constant 0 : index
    %70 = vector.load %arg8[%c24_47, %c0_48] : memref<72x256xf32, #tpu.memory_space<vmem>>, vector<8x256xf32>
    tpu.vector_store %arg8[%c24_47, %c0_48], %69 {strides = array<i32>} : memref<72x256xf32, #tpu.memory_space<vmem>>, vector<8x256xf32>,
    %c32_49 = arith.constant 32 : index
    %c0_50 = arith.constant 0 : index
    %71 = vector.load %arg8[%c32_49, %c0_50] : memref<72x256xf32, #tpu.memory_space<vmem>>, vector<8x256xf32>
    tpu.vector_store %arg8[%c32_49, %c0_50], %50 {strides = array<i32>} : memref<72x256xf32, #tpu.memory_space<vmem>>, vector<8x256xf32>,
    %c255_i32_51 = arith.constant 255 : i32
    %72 = tpu.dynamic_rotate %50 by %c255_i32_51 dim 1 : vector<8x256xf32>, i32 -> vector<8x256xf32>
    %c5_52 = arith.constant 5 : index
    %c0_53 = arith.constant 0 : index
    %73 = vector.load %arg6[%c5_52, %c0_53] : memref<9x256xf32, #tpu.memory_space<vmem>>, vector<1x256xf32>
    %74 = vector.broadcast %73 : vector<1x256xf32> to vector<8x256xf32>
    %75 = arith.mulf %72, %74 : vector<8x256xf32>
    %c40_54 = arith.constant 40 : index
    %c0_55 = arith.constant 0 : index
    %76 = vector.load %arg8[%c40_54, %c0_55] : memref<72x256xf32, #tpu.memory_space<vmem>>, vector<8x256xf32>
    tpu.vector_store %arg8[%c40_54, %c0_55], %75 {strides = array<i32>} : memref<72x256xf32, #tpu.memory_space<vmem>>, vector<8x256xf32>,
    %c241_i32_56 = arith.constant 241 : i32
    %77 = tpu.dynamic_rotate %50 by %c241_i32_56 dim 1 : vector<8x256xf32>, i32 -> vector<8x256xf32>
    %c6_57 = arith.constant 6 : index
    %c0_58 = arith.constant 0 : index
    %78 = vector.load %arg6[%c6_57, %c0_58] : memref<9x256xf32, #tpu.memory_space<vmem>>, vector<1x256xf32>
    %79 = vector.broadcast %78 : vector<1x256xf32> to vector<8x256xf32>
    %80 = arith.mulf %77, %79 : vector<8x256xf32>
    %c48_59 = arith.constant 48 : index
    %c0_60 = arith.constant 0 : index
    %81 = vector.load %arg8[%c48_59, %c0_60] : memref<72x256xf32, #tpu.memory_space<vmem>>, vector<8x256xf32>
    tpu.vector_store %arg8[%c48_59, %c0_60], %80 {strides = array<i32>} : memref<72x256xf32, #tpu.memory_space<vmem>>, vector<8x256xf32>,
    %c240_i32_61 = arith.constant 240 : i32
    %82 = tpu.dynamic_rotate %50 by %c240_i32_61 dim 1 : vector<8x256xf32>, i32 -> vector<8x256xf32>
    %c7_62 = arith.constant 7 : index
    %c0_63 = arith.constant 0 : index
    %83 = vector.load %arg6[%c7_62, %c0_63] : memref<9x256xf32, #tpu.memory_space<vmem>>, vector<1x256xf32>
    %84 = vector.broadcast %83 : vector<1x256xf32> to vector<8x256xf32>
    %85 = arith.mulf %82, %84 : vector<8x256xf32>
    %c56_64 = arith.constant 56 : index
    %c0_65 = arith.constant 0 : index
    %86 = vector.load %arg8[%c56_64, %c0_65] : memref<72x256xf32, #tpu.memory_space<vmem>>, vector<8x256xf32>
    tpu.vector_store %arg8[%c56_64, %c0_65], %85 {strides = array<i32>} : memref<72x256xf32, #tpu.memory_space<vmem>>, vector<8x256xf32>,
    %c239_i32_66 = arith.constant 239 : i32
    %87 = tpu.dynamic_rotate %50 by %c239_i32_66 dim 1 : vector<8x256xf32>, i32 -> vector<8x256xf32>
    %c8_67 = arith.constant 8 : index
    %c0_68 = arith.constant 0 : index
    %88 = vector.load %arg6[%c8_67, %c0_68] : memref<9x256xf32, #tpu.memory_space<vmem>>, vector<1x256xf32>
    %89 = vector.broadcast %88 : vector<1x256xf32> to vector<8x256xf32>
    %90 = arith.mulf %87, %89 : vector<8x256xf32>
    %c64_69 = arith.constant 64 : index
    %c0_70 = arith.constant 0 : index
    %91 = vector.load %arg8[%c64_69, %c0_70] : memref<72x256xf32, #tpu.memory_space<vmem>>, vector<8x256xf32>
    tpu.vector_store %arg8[%c64_69, %c0_70], %90 {strides = array<i32>} : memref<72x256xf32, #tpu.memory_space<vmem>>, vector<8x256xf32>,
    %c0_71 = arith.constant 0 : index
    %c0_72 = arith.constant 0 : index
    %92 = vector.load %arg4[%c0_71, %c0_72] : memref<8x72xf32, #tpu.memory_space<vmem>>, vector<8x72xf32>
    %c0_73 = arith.constant 0 : index
    %c0_74 = arith.constant 0 : index
    %93 = vector.load %arg8[%c0_73, %c0_74] : memref<72x256xf32, #tpu.memory_space<vmem>>, vector<72x256xf32>
    %cst_75 = arith.constant dense<0.000000e+00> : vector<8x256xf32>
    %94 = tpu.matmul %92, %93, %cst_75 {dimension_numbers = #tpu.dot_dimension_numbers<[1], [0], [0], [1], [0, 0, 1, 1], [], []>} : vector<8x72xf32>, vector<72x256xf32>, vector<8x256xf32> -> vector<8x256xf32>
    %c0_76 = arith.constant 0 : index
    %c0_77 = arith.constant 0 : index
    %95 = vector.load %arg5[%c0_76, %c0_77] : memref<8x1xf32, #tpu.memory_space<vmem>>, vector<8x1xf32>
    %96 = vector.broadcast %95 : vector<8x1xf32> to vector<8x256xf32>
    %97 = arith.addf %94, %96 : vector<8x256xf32>
    %98 = arith.addf %97, %1 : vector<8x256xf32>
    %c0_78 = arith.constant 0 : index
    %c0_79 = arith.constant 0 : index
    %c0_80 = arith.constant 0 : index
    %99 = vector.load %arg7[%c0_78, %c0_79, %c0_80] : memref<1x8x256xf32, #tpu.memory_space<vmem>>, vector<1x8x256xf32>
    %100 = vector.shape_cast %99 : vector<1x8x256xf32> to vector<8x256xf32>
    %101 = vector.shape_cast %98 : vector<8x256xf32> to vector<1x8x256xf32>
    tpu.vector_store %arg7[%c0_78, %c0_79, %c0_80], %101 {strides = array<i32>} : memref<1x8x256xf32, #tpu.memory_space<vmem>>, vector<1x8x256xf32>,
    return
  }
  func.func @transform_0(%arg0: i32) -> (i32, i32, i32) {
    %c0_i32 = arith.constant 0 : i32
    %c0_i32_0 = arith.constant 0 : i32
    %c0_i32_1 = arith.constant 0 : i32
    return %arg0, %c0_i32, %c0_i32_0 : i32, i32, i32
  }
  func.func @transform_1(%arg0: i32) -> (i32, i32) {
    %c0_i32 = arith.constant 0 : i32
    %c0_i32_0 = arith.constant 0 : i32
    %c0_i32_1 = arith.constant 0 : i32
    return %c0_i32, %c0_i32_0 : i32, i32
  }
  func.func @transform_2(%arg0: i32) -> (i32, i32) {
    %c0_i32 = arith.constant 0 : i32
    %c0_i32_0 = arith.constant 0 : i32
    %c0_i32_1 = arith.constant 0 : i32
    return %c0_i32, %c0_i32_0 : i32, i32
  }
  func.func @transform_3(%arg0: i32) -> (i32, i32) {
    %c0_i32 = arith.constant 0 : i32
    %c0_i32_0 = arith.constant 0 : i32
    %c0_i32_1 = arith.constant 0 : i32
    return %c0_i32, %c0_i32_0 : i32, i32
  }
  func.func @transform_4(%arg0: i32) -> (i32, i32) {
    %c0_i32 = arith.constant 0 : i32
    %c0_i32_0 = arith.constant 0 : i32
    %c0_i32_1 = arith.constant 0 : i32
    return %c0_i32, %c0_i32_0 : i32, i32
  }
  func.func @transform_5(%arg0: i32) -> (i32, i32) {
    %c0_i32 = arith.constant 0 : i32
    %c0_i32_0 = arith.constant 0 : i32
    %c0_i32_1 = arith.constant 0 : i32
    return %c0_i32, %c0_i32_0 : i32, i32
  }
  func.func @transform_6(%arg0: i32) -> (i32, i32, i32) {
    %c0_i32 = arith.constant 0 : i32
    %c0_i32_0 = arith.constant 0 : i32
    %c0_i32_1 = arith.constant 0 : i32
    return %arg0, %c0_i32, %c0_i32_0 : i32, i32, i32
  }
}

</mosaic_0001>

<bundles_post_ra>
// kernel: tpu_custom_call.1
= control target key start
LH: loop header
LB: loop body
LE: loop exit
PB: predicated region body
PF: predicated region fallthrough
CT: control target
= control target key end

     0   :  { %11 = vsyncpa [#allocation4], 0  ;;  %s1803_s0 = inlined_call_operand.hbm [shape: f32[2,8,256], index: 0, kind: input, shape index: {}]   ;;  %s1804_s1 = inlined_call_operand.hbm [shape: f32[8,72], index: 1, kind: input, shape index: {}]   ;;  %s1805_s2 = inlined_call_operand.vmem [shape: f32[8,1], index: 2, kind: input, shape index: {}]   ;;  %s1806_s3 = inlined_call_operand.hbm [shape: f32[8,72], index: 3, kind: input, shape index: {}]   ;;  %s1807_s4 = inlined_call_operand.vmem [shape: f32[8,1], index: 4, kind: input, shape index: {}]   ;;  %s1808_s5 = inlined_call_operand.vmem [shape: f32[9,256], index: 5, kind: input, shape index: {}]   ;;  %s1809_s6 = inlined_call_operand.hbm [shape: f32[2,8,256], index: 6, kind: output, shape index: {}]  }
   0x1   :  { %13 = vsyncpa [#allocation4 + $0x1], 0 }
   0x2   :  { %14 = vsyncpa [#allocation7], 0 }
   0x3   :  { %15 = vsyncpa [#allocation5], 0 }
   0x4   :  { %17 = vsyncpa [#allocation5 + $0x1], 0  ;;  %s1330_s21 = smov 0   ;;  %s1332_s22 = smov 0  }
   0x5   :  { %s1334_s23 = smov 0   ;;  %s1336_s24 = smov 0  }
   0x6 LB: > { %s1351_s25 = sadd.s32 4294967295, %s1279_s24   ;;  %s977_s26 = sadd.s32 4294967294, %s1279_s24   ;;  %s1279_s24 = sphi %s1336_s24, %s1831_s24   ;;  %s1275_s23 = sphi %s1334_s23, %s1830_s23   ;;  %s1271_s22 = sphi %s1332_s22, %s1829_s22   ;;  %s1267_s21 = sphi %s1330_s21, %s1828_s21  }
   0x7   : > { %p43_p0 = scmp.ne.s32.totalorder %s1271_s22, %s1267_s21  ;;  %p1810_p1 = scmp.eq.s32.totalorder %s1351_s25, 0 }
   0x8   : > { %p178_p3 = scmp.eq.s32.totalorder %s977_s26, 1  ;;  %p978_p5 = scmp.ge.s32.totalorder %s1279_s24, 1 }
   0x9   : > { %p1360_p4 = por %p1810_p1, %p43_p0  ;;  %p185_p7 = scmp.lt.s32.totalorder %s1279_s24, 3 }
   0xa   : > { %p1365_p6 = por %p178_p3, %p43_p0  ;;  %s1281_s30 = smov [#allocation6]  }
   0xb   : > { %s1814_s27 = scalar_select %p1360_p4, 1, 0 }
   0xc   : > { %s1815_s28 = scalar_select %p1365_p6, 1, 0 }
   0xd   : > { %p1370_p8 = pnand %p978_p5, %p185_p7  ;;  %s198_s7 = sshll.u32 %s1281_s30, 4  ;;  %s199_s7 = int_to_ptr.vmem [resolvable:$true] %s198_s7 }
   0xe   : > { %s1282_s8 = smov [#allocation8]   ;;  %s1386_s11 = sadd.s32 1, %s1279_s24  }
   0xf   : > { %s1816_s29 = scalar_select %p1370_p8, 1, 0 }
  0x10   : > { %p1057_p10 = pneg %p1370_p8  ;;  %s212_s9 = sshll.u32 %s1282_s8, 4  ;;  %s1383_s9 = int_to_ptr.vmem [resolvable:$true] %s212_s9 }
  0x11   : > { %s27_s12 = ssub.s32 %s1279_s24, %s1386_s11  ;;  %s1123_s15 = scalar_lea.hbm %s1804_s1, 128 }
  0x12   : > { %p1379_p11 = pnand %p1057_p10, %p1810_p1  ;;  %p1124_p12 = scmp.ne.s32.totalorder %s1804_s1, %s1123_s15 }
  0x13   : > { %p1130_p5 = scmp.lt.u32.totalorder %s1123_s15, %s1804_s1 }
  0x14   : > { %p1125_p13 = pneg %p1379_p11 }
  0x16   : > { %p1126_p0 = pnand %p1125_p13, %p1124_p12 }
  0x18   : > { %p1127_p3 = pneg %p1126_p0 }
  0x1a   : > { %p1132_p7 = pnand %p1130_p5, %p1127_p3 }
  0x1c   : > { %1135 = shalt.err (!%p1132_p7)
}
  0x1d   : > { %s1136_s20 = scalar_lea.vmem %s199_s7, 128  ;;  %p1144_p2 = scmp.lt.s32.totalorder %s199_s7, %s199_s7 }
  0x1e   : > { %p1137_p10 = scmp.ne.s32.totalorder %s199_s7, %s1136_s20  ;;  %p1145_p6 = scmp.lt.s32.totalorder %s1136_s20, %s1136_s20 }
  0x20   : > { %p1139_p9 = pnand %p1137_p10, %p1125_p13  ;;  %p1146_p4 = por %p1145_p6, %p1144_p2 }
  0x22   : > { %p1140_p1 = pneg %p1139_p9 }
  0x24   : > { %p1147_p8 = pnand %p1146_p4, %p1140_p1 }
  0x26   : > { %1150 = shalt.err (!%p1147_p8)
}
  0x27   : > { %1060 = dma.hbm_to_vmem [thread:$0]  (!%p1379_p11), %s1804_s1, 128, %s199_s7, [#allocation7]  }
  0x28   : > { %s1151_s14 = scalar_lea.hbm %s1806_s3, 128 }
  0x29   : > { %p1152_p9 = scmp.ne.s32.totalorder %s1806_s3, %s1151_s14  ;;  %p1158_p4 = scmp.lt.u32.totalorder %s1151_s14, %s1806_s3 }
  0x2b   : > { %p1154_p2 = pnand %p1152_p9, %p1125_p13 }
  0x2d   : > { %p1155_p1 = pneg %p1154_p2 }
  0x2f   : > { %p1160_p6 = pnand %p1158_p4, %p1155_p1 }
  0x31   : > { %1163 = shalt.err (!%p1160_p6)
}
  0x32   : > { %s1164_s7 = scalar_lea.vmem %s1383_s9, 128  ;;  %p1172_p3 = scmp.lt.s32.totalorder %s1383_s9, %s1383_s9 }
  0x33   : > { %p1165_p8 = scmp.ne.s32.totalorder %s1383_s9, %s1164_s7  ;;  %p1173_p5 = scmp.lt.s32.totalorder %s1164_s7, %s1164_s7 }
  0x35   : > { %p1167_p12 = pnand %p1165_p8, %p1125_p13  ;;  %p1174_p7 = por %p1173_p5, %p1172_p3 }
  0x37   : > { %p1168_p0 = pneg %p1167_p12 }
  0x39   : > { %p1175_p10 = pnand %p1174_p7, %p1168_p0 }
  0x3b   : > { %1178 = shalt.err (!%p1175_p10)
}
  0x3c   : > { %1063 = dma.hbm_to_vmem [thread:$0]  (!%p1379_p11), %s1806_s3, 128, %s1383_s9, [#allocation7]  }
  0x3d   : > { %p28_p13 = scmp.eq.s32.totalorder %s27_s12, 0  ;;  %s30_s26 = sadd.s32 1, %s1275_s23 }
  0x3e   : > { %p37_p9 = scmp.ne.s32.totalorder %s1275_s23, %s1271_s22  ;;  %p38_p2 = scmp.eq.s32.totalorder %s1279_s24, 0 }
  0x3f   : > { %s1445_s10 = scalar_select %p28_p13, %s1275_s23, %s30_s26  }
  0x40   : > { %p39_p1 = por %p38_p2, %p37_p9  ;;  %p1818_p4 = scmp.eq.s32.totalorder %s1351_s25, 1 }
  0x41   : > { %p1074_p8 = scmp.lt.s32.totalorder %s1279_s24, 2  ;;  %s229_s8 = sand.u32 1, %s1275_s23  }
  0x42   : > { %p1449_p6 = por %p1818_p4, %p37_p9  ;;  %s982_s13 = sshll.u32 %s229_s8, 4 }
  0x43   : > { %s1011_s14 = sshll.u32 %s1279_s24, 8  ;;  %s233_s12 = scalar_lea.vmem [#allocation3], %s982_s13 }
  0x44   : > { %s1459_s9 = scalar_lea.hbm %s1803_s0, %s1011_s14  ;;  %s241_s17 = sshll.u32 %s233_s12, 4  ;;  %s1461_s17 = int_to_ptr.vmem [resolvable:$true] %s241_s17 }
  0x45   : > { %p1463_p11 = pnand %p1074_p8, %p39_p1  ;;  %s230_s7 = scalar_lea.sflag [#allocation4], %s229_s8 }
  0x46   : > { %s1179_s19 = scalar_lea.hbm %s1459_s9, 256  ;;  %s1184_s13 = scalar_lea.hbm %s1803_s0, 512 }
  0x47   : > { %p1180_p12 = scmp.ne.s32.totalorder %s1459_s9, %s1179_s19  ;;  %p1181_p0 = pneg %p1463_p11 }
  0x48   : > { %p1185_p7 = scmp.lt.u32.totalorder %s1459_s9, %s1803_s0  ;;  %p1186_p10 = scmp.lt.u32.totalorder %s1184_s13, %s1179_s19 }
  0x49   : > { %p1182_p3 = pnand %p1181_p0, %p1180_p12  ;;  %p1188_p9 = scmp.lt.u32.totalorder %s1179_s19, %s1459_s9 }
  0x4a   : > { %p1187_p13 = por %p1186_p10, %p1185_p7 }
  0x4b   : > { %p1183_p5 = pneg %p1182_p3 }
  0x4c   : > { %p1189_p2 = por %p1188_p9, %p1187_p13 }
  0x4e   : > { %p1190_p1 = pnand %p1189_p2, %p1183_p5 }
  0x50   : > { %1193 = shalt.err (!%p1190_p1)
}
  0x51   : > { %s1194_s8 = scalar_lea.vmem %s1461_s17, 256  ;;  %s1283_s16 = smov [#allocation3]  }
  0x52   : > { %p1195_p4 = scmp.ne.s32.totalorder %s1461_s17, %s1194_s8  ;;  %s1199_s12 = sshll.u32 %s1283_s16, 4  ;;  %s1200_s12 = int_to_ptr.vmem [resolvable:$false] %s1199_s12 }
  0x53   : > { %s1201_s20 = scalar_lea.vmem %s1200_s12, 512  ;;  %p1202_p3 = scmp.lt.s32.totalorder %s1461_s17, %s1200_s12 }
  0x54   : > { %p1197_p8 = pnand %p1195_p4, %p1181_p0  ;;  %p1203_p7 = scmp.lt.s32.totalorder %s1201_s20, %s1194_s8 }
  0x56   : > { %p1198_p12 = pneg %p1197_p8  ;;  %p1204_p10 = por %p1203_p7, %p1202_p3 }
  0x58   : > { %p1205_p13 = pnand %p1204_p10, %p1198_p12 }
  0x5a   : > { %1208 = shalt.err (!%p1205_p13)
}
  0x5b   : > { %1067 = dma.hbm_to_vmem [thread:$0]  (!%p1463_p11), %s1459_s9, 256, %s1461_s17, %s230_s7  }
  0x5c   : > { %p1821_p5 = scmp.ne.s32.totalorder %s1816_s29, 0 }
  0x5d   : > { %s1495_s19 = sand.u32 (!%p1821_p5), 1, %s1271_s22   ;;  %p1822_p0 = scmp.ne.s32.totalorder (!%p1821_p5), %s1814_s27, 0 }
  0x5e   : > { %250 = sbr.rel (%p1821_p5) target bundleno = 857 (0x359), region = 44  ;;  %s1813_s26 = sshll.u32 (!%p1821_p5), %s1495_s19, 4 }
  0x5f   : > { %s253_s13 = scalar_lea.sflag (!%p1821_p5), [#allocation4], %s1495_s19  ;;  %s256_s14 = scalar_lea.vmem (!%p1821_p5), [#allocation3], %s1813_s26 }
  0x65   : > { %1254 = dma.done.wait (%p1822_p0), %s253_s13, 256  }
  0x66   : > { %1256 = vsyncadd (%p1822_p0), %s253_s13, 4294967040  ;;  %p1823_p11 = scmp.eq.s32.totalorder %s1351_s25, 0 }
  0x68   : > { %1258 = dma.done.wait (%p1823_p11), [#allocation7], 256   ;;  %p1824_p9 = pmov %p1823_p11 }
  0x69   : > { %v1509_v0 = vld [vmem:[%s256_s14] sm:$0xff]  ;;  %s1284_s29 = smov 16   ;;  %s1285_s9 = smov 17   ;;  %v1515_v1 = vld [vmem:[%s256_s14 + $0x8] sm:$0xff]  ;;  %v1290_v2 = vmov 0.0   ;;  %v1291_v3 = vmov 0   ;;  %v299_v5 = vlaneseq }
  0x6a   : > { %1260 = vsyncadd (%p1824_p9), [#allocation7], 4294967040  ;;  %320 = vrot.lane.b32.xlu1 %v1509_v0, %s1284_s29  ;;  %295 = vrot.lane.b32.xlu0 %v1509_v0, %s1285_s9  ;;  %s1286_s27 = smov 15   ;;  %s1287_s17 = smov 1   ;;  %v509_v4 = vld [vmem:[%s1805_s2] sm:$0xff]  ;;  %vm515_vm8 = vcmask 588800  }
  0x6b   : > { %s1288_s18 = smov 127   ;;  %s1289_s7 = smov 113   ;;  %583 = vmatprep.mubr.f32.mxu0 %v1290_v2  ;;  %862 = vmatprep.mubr.f32.mxu1 %v1290_v2  ;;  %v307_v6 = vshrl.u32 %v299_v5, 7  ;;  %v1548_v7 = vand.u32 127, %v299_v5 }
  0x6c   : > { %1122 = vset.pattern.permute.xlu0 %v1291_v3  ;;  %s1292_s15 = smov 112   ;;  %s1293_s8 = smov 111   ;;  %v990_v10 = vld [vmem:[%s1808_s5 + $0x1] ss:$8 sm:$0x3] }
  0x6d   : > { %v1550_v8 = vsub.s32 0, %v307_v6  ;;  %v1552_v9 = vsub.s32 1, %v307_v6  ;;  %v304_v11 = vld [vmem:[%s1808_s5] ss:$8 sm:$0x3]  ;;  %vm324_vm0 = vcmp.lt.s32.totalorder %v1548_v7, 16 }
  0x6e   : > { %322 = vrot.lane.b32.xlu1 %v1515_v1, %s1284_s29  ;;  %297 = vrot.lane.b32.xlu0 %v1515_v1, %s1285_s9  ;;  %vm301_vm1 = vcmp.lt.s32.totalorder %v1548_v7, 17  ;;  %v991_v28 = vld [vmem:[%s1808_s5 + $0x2] ss:$8 sm:$0x3]  ;;  %vm348_vm2 = vcmp.lt.s32.totalorder %v1548_v7, 15  ;;  %vm372_vm3 = vcmp.lt.s32.totalorder %v1548_v7, 1 }
  0x6f   : > { %v333_v14 = vrot.slane %v990_v10, %v1550_v8  ;;  %v309_v15 = vrot.slane %v304_v11, %v1550_v8  ;;  %v313_v16 = vrot.slane %v304_v11, %v1552_v9  ;;  %v337_v17 = vrot.slane %v990_v10, %v1552_v9  ;;  %v992_v29 = vld [vmem:[%s1808_s5 + $0x3] ss:$8 sm:$0x3]  ;;  %v993_v38 = vld [vmem:[%s1808_s5 + $0x5] ss:$8 sm:$0x3] }
  0x70   : > { %v357_v34 = vrot.slane %v991_v28, %v1550_v8  ;;  %v361_v35 = vrot.slane %v991_v28, %v1552_v9  ;;  %v381_v36 = vrot.slane %v992_v29, %v1550_v8  ;;  %v385_v37 = vrot.slane %v992_v29, %v1552_v9  ;;  %v994_v59 = vld [vmem:[%s1808_s5 + $0x6] ss:$8 sm:$0x3]  ;;  %v995_v60 = vld [vmem:[%s1808_s5 + $0x7] ss:$8 sm:$0x3] }
  0x71   : > { %vm398_vm4 = vcmp.lt.s32.totalorder %v1548_v7, 127  ;;  %v407_v45 = vrot.slane %v993_v38, %v1550_v8  ;;  %v411_v46 = vrot.slane %v993_v38, %v1552_v9  ;;  %vm422_vm5 = vcmp.lt.s32.totalorder %v1548_v7, 113  ;;  %v996_v10 = vld [vmem:[%s1808_s5 + $0x10] ss:$8 sm:$0x3]  ;;  %s1825_s26 = sshll.u32 %s1495_s19, 4 }
  0x72   : > { %346 = vrot.lane.b32.xlu1 %v1515_v1, %s1286_s27  ;;  %344 = vrot.lane.b32.xlu0 %v1509_v0, %s1286_s27  ;;  %v431_v3 = vrot.slane %v994_v59, %v1550_v8  ;;  %vm446_vm6 = vcmp.lt.s32.totalorder %v1548_v7, 112  ;;  %v455_v5 = vrot.slane %v995_v60, %v1550_v8  ;;  %v459_v6 = vrot.slane %v995_v60, %v1552_v9  ;;  %v999_v60 = vld [vmem:[%s1808_s5 + $0x2] ss:$8 sm:$0x3]  ;;  %s1294_s13 = smov [#allocation9]  }
  0x73   : > { %vm470_vm7 = vcmp.lt.s32.totalorder %v1548_v7, 111  ;;  %s1213_s14 = sshll.u32 %s1294_s13, 4  ;;  %s1214_s14 = int_to_ptr.vmem [resolvable:$false] %s1213_s14 }
  0x76   : > { %370 = vrot.lane.b32.xlu1 %v1515_v1, %s1287_s17  ;;  %368 = vrot.lane.b32.xlu0 %v1509_v0, %s1287_s17 }
  0x7a   : > { %396 = vrot.lane.b32.xlu1 %v1515_v1, %s1288_s18  ;;  %394 = vrot.lane.b32.xlu0 %v1509_v0, %s1288_s18 }
  0x7e   : > { %420 = vrot.lane.b32.xlu1 %v1515_v1, %s1289_s7  ;;  %418 = vrot.lane.b32.xlu0 %v1509_v0, %s1289_s7 }
  0x82   : > { %444 = vrot.lane.b32.xlu1 %v1515_v1, %s1292_s15  ;;  %442 = vrot.lane.b32.xlu0 %v1509_v0, %s1292_s15 }
  0x86   : > { %468 = vrot.lane.b32.xlu1 %v1515_v1, %s1293_s8  ;;  %466 = vrot.lane.b32.xlu0 %v1509_v0, %s1293_s8 }
  0x8a   : > { %512 = vperm.xlu0 %1122, %v509_v4   ;;  %v435_v4 = vrot.slane %v994_v59, %v1552_v9 }
  0xdc   : > { %v321_v12 = vpop.permute.xlu1 %320  ;;  %v296_v13 = vpop.permute.xlu0 %295 }
  0xe0   : > { %v323_v18 = vpop.permute.xlu1 %322  ;;  %v298_v19 = vpop.permute.xlu0 %297 }
  0xe1   : > { %v325_v20 = vsel %vm324_vm0, %v321_v12, %v323_v18  ;;  %v326_v21 = vsel %vm324_vm0, %v323_v18, %v321_v12  ;;  %v302_v22 = vsel %vm301_vm1, %v296_v13, %v298_v19  ;;  %v303_v23 = vsel %vm301_vm1, %v298_v19, %v296_v13 }
  0xe2   : > { %v340_v24 = vmul.f32 %v333_v14, %v326_v21  ;;  %v316_v25 = vmul.f32 %v309_v15, %v303_v23  ;;  %v317_v26 = vmul.f32 %v313_v16, %v302_v22  ;;  %v341_v27 = vmul.f32 %v337_v17, %v325_v20 }
  0xe3   : > { %v483_v17 = vrot.slane %v996_v10, %v1552_v9  ;;  %v479_v22 = vrot.slane %v996_v10, %v1550_v8 }
  0xe4   : > { %v347_v30 = vpop.permute.xlu1 %346  ;;  %v345_v31 = vpop.permute.xlu0 %344  ;;  %v1013_v32 = vpack.c.bf16 %v341_v27, %v317_v26  ;;  %v1015_v33 = vpack.c.bf16 %v340_v24, %v316_v25 }
  0xe5   : > { %v349_v39 = vsel %vm348_vm2, %v345_v31, %v347_v30  ;;  %v350_v40 = vsel %vm348_vm2, %v347_v30, %v345_v31  ;;  %v490_v31 = vld [vmem:[#allocation6] sm:$0xff] }
  0xe6   : > { %1014 = vmatprep.subr.bf16.mxu0 %v1013_v32  ;;  %v364_v47 = vmul.f32 %v357_v34, %v350_v40  ;;  %v365_v48 = vmul.f32 %v361_v35, %v349_v39  ;;  %v789_v39 = vld [vmem:[%s1807_s4] sm:$0xff] }
  0xe7   : > { %1016 = vmatpush1.bf16.msra.mxu0 %v1015_v33 }
  0xe8   : > { %v371_v41 = vpop.permute.xlu1 %370  ;;  %v369_v42 = vpop.permute.xlu0 %368 }
  0xe9   : > { %v373_v43 = vsel %vm372_vm3, %v369_v42, %v371_v41  ;;  %v374_v44 = vsel %vm372_vm3, %v371_v41, %v369_v42  ;;  %v598_v42 = vld [vmem:[%s1808_s5] ss:$8 sm:$0x3] }
  0xea   : > { %v388_v49 = vmul.f32 %v381_v36, %v374_v44  ;;  %v389_v50 = vmul.f32 %v385_v37, %v373_v43  ;;  %v998_v43 = vld [vmem:[%s1808_s5 + $0x1] ss:$8 sm:$0x3] }
  0xec   : > { %v397_v51 = vpop.permute.xlu1 %396  ;;  %v395_v52 = vpop.permute.xlu0 %394  ;;  %v1017_v53 = vpack.c.bf16 %v389_v50, %v365_v48  ;;  %v1019_v54 = vpack.c.bf16 %v388_v49, %v364_v47  ;;  %v625_v47 = vrot.slane %v998_v43, %v1550_v8  ;;  %v607_v48 = vrot.slane %v598_v42, %v1552_v9 }
  0xed   : > { %v399_v55 = vsel %vm398_vm4, %v395_v52, %v397_v51  ;;  %v400_v56 = vsel %vm398_vm4, %v397_v51, %v395_v52  ;;  %v629_v49 = vrot.slane %v998_v43, %v1552_v9  ;;  %v1004_v43 = vld [vmem:[%s1808_s5 + $0x10] ss:$8 sm:$0x3] }
  0xee   : > { %v414_v57 = vmul.f32 %v407_v45, %v399_v55  ;;  %v415_v58 = vmul.f32 %v411_v46, %v400_v56  ;;  %1018 = vmatprep.subr.bf16.mxu0 %v1017_v53  ;;  %v603_v46 = vrot.slane %v598_v42, %v1550_v8 }
  0xef   : > { %1020 = vmatpush1.bf16.msra.mxu0 %v1019_v54 }
  0xf0   : > { %v421_v61 = vpop.permute.xlu1 %420  ;;  %v419_v62 = vpop.permute.xlu0 %418  ;;  %v1021_v63 = vpack.c.bf16 %v415_v58, %v1515_v1  ;;  %v1023_v2 = vpack.c.bf16 %v414_v57, %v1509_v0 }
  0xf1   : > { %v423_v11 = vsel %vm422_vm5, %v419_v62, %v421_v61  ;;  %v424_v12 = vsel %vm422_vm5, %v421_v61, %v419_v62  ;;  %v1000_v61 = vld [vmem:[%s1808_s5 + $0x3] ss:$8 sm:$0x3] }
  0xf2   : > { %1022 = vmatprep.subr.bf16.mxu0 %v1021_v63  ;;  %v438_v18 = vmul.f32 %v431_v3, %v423_v11  ;;  %v439_v19 = vmul.f32 %v435_v4, %v424_v12  ;;  %v647_v4 = vrot.slane %v999_v60, %v1550_v8  ;;  %v673_v10 = vrot.slane %v1000_v61, %v1552_v9  ;;  %v1001_v11 = vld [vmem:[%s1808_s5 + $0x5] ss:$8 sm:$0x3] }
  0xf3   : > { %1024 = vmatpush1.bf16.msra.mxu0 %v1023_v2 }
  0xf4   : > { %v445_v13 = vpop.permute.xlu1 %444  ;;  %v443_v14 = vpop.permute.xlu0 %442 }
  0xf5   : > { %v447_v15 = vsel %vm446_vm6, %v443_v14, %v445_v13  ;;  %v448_v16 = vsel %vm446_vm6, %v445_v13, %v443_v14 }
  0xf6   : > { %v462_v20 = vmul.f32 %v455_v5, %v447_v15  ;;  %v463_v21 = vmul.f32 %v459_v6, %v448_v16  ;;  %v651_v5 = vrot.slane %v999_v60, %v1552_v9  ;;  %v669_v6 = vrot.slane %v1000_v61, %v1550_v8  ;;  %v770_v60 = vld [vmem:[#allocation8] sm:$0xff] }
  0xf8   : > { %v469_v23 = vpop.permute.xlu1 %468  ;;  %v1025_v24 = vpack.c.bf16 %v463_v21, %v439_v19  ;;  %v467_v25 = vpop.permute.xlu0 %466  ;;  %v1027_v26 = vpack.c.bf16 %v462_v20, %v438_v18  ;;  %v697_v18 = vrot.slane %v1001_v11, %v1552_v9 }
  0xf9   : > { %v471_v27 = vsel %vm470_vm7, %v467_v25, %v469_v23  ;;  %v472_v28 = vsel %vm470_vm7, %v469_v23, %v467_v25 }
  0xfa   : > { %1026 = vmatprep.subr.bf16.mxu0 %v1025_v24  ;;  %v487_v29 = vmul.f32 %v483_v17, %v472_v28  ;;  %v486_v30 = vmul.f32 %v479_v22, %v471_v27  ;;  %v693_v17 = vrot.slane %v1001_v11, %v1550_v8 }
  0xfb   : > { %1028 = vmatpush1.bf16.msra.mxu0 %v1027_v26 }
  0xfc   : > { %535 = vmatprep.subr.mxu0 %v487_v29 }
  0xff   : > { %536 = vmatpush1.msra.mxu0 %v486_v30 }
 0x100   : > { %997 = vmatmul.mubr.msk.f32.vlgmr.msra.gmra.mrb[0].mxu0 %vm515_vm8, %v490_v31  ;;  %v1002_v31 = vld [vmem:[%s1808_s5 + $0x6] ss:$8 sm:$0x3] }
 0x109   : > { %v513_v32 = vpop.permute.xlu0 %512 }
 0x1d3   : > { %v585_v33 = vpop.f32.mrb[0].mxu0 }
 0x1d4   : > { %v586_v34 = vadd.f32 %v585_v33, %v513_v32  ;;  %v587_v35 = vpop.f32.mrb[1].mxu0 }
 0x1d5   : > { %v588_v37 = vadd.f32 %v587_v35, %v513_v32  ;;  %v1003_v32 = vld [vmem:[%s1808_s5 + $0x7] ss:$8 sm:$0x3] }
 0x1d6   : > { %v1637_v36 = vmax.f32 %v586_v34, 0.0  ;;  %v741_v42 = vrot.slane %v1003_v32, %v1552_v9 }
 0x1d7   : > { %v1643_v38 = vmax.f32 %v588_v37, 0.0 }
 0x1d8   : > { %614 = vrot.lane.b32.xlu0 %v1637_v36, %s1284_s29  ;;  %592 = vrot.lane.b32.xlu1 %v1637_v36, %s1285_s9 }
 0x1dc   : > { %636 = vrot.lane.b32.xlu0 %v1637_v36, %s1286_s27  ;;  %594 = vrot.lane.b32.xlu1 %v1643_v38, %s1285_s9 }
 0x1e0   : > { %658 = vrot.lane.b32.xlu0 %v1637_v36, %s1287_s17  ;;  %616 = vrot.lane.b32.xlu1 %v1643_v38, %s1284_s29  ;;  %s1215_s29 = scalar_lea.vmem %s1214_s14, 512 }
 0x1e4   : > { %682 = vrot.lane.b32.xlu0 %v1637_v36, %s1288_s18  ;;  %638 = vrot.lane.b32.xlu1 %v1643_v38, %s1286_s27 }
 0x1e8   : > { %704 = vrot.lane.b32.xlu0 %v1637_v36, %s1289_s7  ;;  %660 = vrot.lane.b32.xlu1 %v1643_v38, %s1287_s17 }
 0x1ec   : > { %726 = vrot.lane.b32.xlu0 %v1637_v36, %s1292_s15  ;;  %684 = vrot.lane.b32.xlu1 %v1643_v38, %s1288_s18  ;;  %s1012_s18 = sshll.u32 %s1351_s25, 8  ;;  %s874_s25 = scalar_lea.sflag [#allocation5], %s1495_s19 }
 0x1ed   : > { %s1759_s12 = scalar_lea.hbm %s1809_s6, %s1012_s18 }
 0x1f0   : > { %748 = vrot.lane.b32.xlu0 %v1637_v36, %s1293_s8  ;;  %706 = vrot.lane.b32.xlu1 %v1643_v38, %s1289_s7  ;;  %s292_s7 = scalar_lea.vmem [#allocation9], %s1825_s26 }
 0x1f4   : > { %792 = vperm.xlu0 %1122, %v789_v39   ;;  %728 = vrot.lane.b32.xlu1 %v1643_v38, %s1292_s15  ;;  %v715_v39 = vrot.slane %v1002_v31, %v1550_v8  ;;  %s888_s15 = sshll.u32 %s292_s7, 4  ;;  %s1761_s15 = int_to_ptr.vmem [resolvable:$true] %s888_s15 }
 0x1f5   : > { %s1209_s20 = scalar_lea.vmem %s1761_s15, 256  ;;  %p1216_p8 = scmp.lt.s32.totalorder %s1761_s15, %s1214_s14 }
 0x1f6   : > { %p1210_p2 = scmp.ne.s32.totalorder %s1761_s15, %s1209_s20  ;;  %p1217_p12 = scmp.lt.s32.totalorder %s1215_s29, %s1209_s20 }
 0x1f8   : > { %750 = vrot.lane.b32.xlu1 %v1643_v38, %s1293_s8  ;;  %p1211_p1 = pnand %p1210_p2, %p1449_p6  ;;  %p1218_p3 = por %p1217_p12, %p1216_p8 }
 0x1fa   : > { %p1212_p4 = pneg %p1211_p1 }
 0x1fc   : > { %p1219_p7 = pnand %p1218_p3, %p1212_p4 }
 0x24a   : > { %v615_v40 = vpop.permute.xlu0 %614  ;;  %v593_v41 = vpop.permute.xlu1 %592 }
 0x24e   : > { %v637_v44 = vpop.permute.xlu0 %636  ;;  %v595_v45 = vpop.permute.xlu1 %594 }
 0x24f   : > { %v596_v50 = vsel %vm301_vm1, %v593_v41, %v595_v45  ;;  %v597_v51 = vsel %vm301_vm1, %v595_v45, %v593_v41  ;;  %v737_v41 = vrot.slane %v1003_v32, %v1550_v8 }
 0x250   : > { %v610_v56 = vmul.f32 %v603_v46, %v597_v51  ;;  %v611_v58 = vmul.f32 %v607_v48, %v596_v50 }
 0x252   : > { %v659_v52 = vpop.permute.xlu0 %658  ;;  %v617_v53 = vpop.permute.xlu1 %616 }
 0x253   : > { %v618_v54 = vsel %vm324_vm0, %v615_v40, %v617_v53  ;;  %v619_v55 = vsel %vm324_vm0, %v617_v53, %v615_v40  ;;  %v719_v40 = vrot.slane %v1002_v31, %v1552_v9 }
 0x254   : > { %v632_v57 = vmul.f32 %v625_v47, %v619_v55  ;;  %v633_v59 = vmul.f32 %v629_v49, %v618_v54  ;;  %v763_v47 = vrot.slane %v1004_v43, %v1552_v9 }
 0x256   : > { %v639_v62 = vpop.permute.xlu1 %638  ;;  %v1029_v63 = vpack.c.bf16 %v633_v59, %v611_v58  ;;  %v1031_v2 = vpack.c.bf16 %v632_v57, %v610_v56  ;;  %v683_v3 = vpop.permute.xlu0 %682  ;;  %v759_v56 = vrot.slane %v1004_v43, %v1550_v8 }
 0x257   : > { %v640_v12 = vsel %vm348_vm2, %v637_v44, %v639_v62  ;;  %v641_v13 = vsel %vm348_vm2, %v639_v62, %v637_v44 }
 0x258   : > { %1030 = vmatprep.subr.bf16.mxu1 %v1029_v63  ;;  %v654_v19 = vmul.f32 %v647_v4, %v641_v13  ;;  %v655_v20 = vmul.f32 %v651_v5, %v640_v12 }
 0x259   : > { %1032 = vmatpush1.bf16.msra.mxu1 %v1031_v2 }
 0x25a   : > { %v661_v14 = vpop.permute.xlu1 %660  ;;  %v705_v23 = vpop.permute.xlu0 %704 }
 0x25b   : > { %v662_v15 = vsel %vm372_vm3, %v659_v52, %v661_v14  ;;  %v663_v16 = vsel %vm372_vm3, %v661_v14, %v659_v52 }
 0x25c   : > { %v676_v21 = vmul.f32 %v669_v6, %v663_v16  ;;  %v677_v22 = vmul.f32 %v673_v10, %v662_v15 }
 0x25e   : > { %v685_v24 = vpop.permute.xlu1 %684  ;;  %v1033_v25 = vpack.c.bf16 %v677_v22, %v655_v20  ;;  %v1035_v26 = vpack.c.bf16 %v676_v21, %v654_v19  ;;  %v727_v37 = vpop.permute.xlu0 %726 }
 0x25f   : > { %v686_v27 = vsel %vm398_vm4, %v683_v3, %v685_v24  ;;  %v687_v28 = vsel %vm398_vm4, %v685_v24, %v683_v3 }
 0x260   : > { %v700_v29 = vmul.f32 %v693_v17, %v686_v27  ;;  %v701_v30 = vmul.f32 %v697_v18, %v687_v28  ;;  %1034 = vmatprep.subr.bf16.mxu1 %v1033_v25 }
 0x261   : > { %1036 = vmatpush1.bf16.msra.mxu1 %v1035_v26 }
 0x262   : > { %v707_v33 = vpop.permute.xlu1 %706  ;;  %v1037_v34 = vpack.c.bf16 %v701_v30, %v1643_v38  ;;  %v1039_v35 = vpack.c.bf16 %v700_v29, %v1637_v36  ;;  %v749_v52 = vpop.permute.xlu0 %748 }
 0x263   : > { %v708_v44 = vsel %vm422_vm5, %v705_v23, %v707_v33  ;;  %v709_v36 = vsel %vm422_vm5, %v707_v33, %v705_v23 }
 0x264   : > { %1038 = vmatprep.subr.bf16.mxu1 %v1037_v34  ;;  %v722_v48 = vmul.f32 %v715_v39, %v708_v44  ;;  %v723_v49 = vmul.f32 %v719_v40, %v709_v36 }
 0x265   : > { %1040 = vmatpush1.bf16.msra.mxu1 %v1039_v35 }
 0x266   : > { %v729_v38 = vpop.permute.xlu1 %728 }
 0x267   : > { %v730_v45 = vsel %vm446_vm6, %v727_v37, %v729_v38  ;;  %v731_v46 = vsel %vm446_vm6, %v729_v38, %v727_v37 }
 0x268   : > { %v744_v50 = vmul.f32 %v737_v41, %v730_v45  ;;  %v745_v51 = vmul.f32 %v741_v42, %v731_v46 }
 0x26a   : > { %v751_v53 = vpop.permute.xlu1 %750  ;;  %v1041_v54 = vpack.c.bf16 %v745_v51, %v723_v49  ;;  %v1043_v55 = vpack.c.bf16 %v744_v50, %v722_v48 }
 0x26b   : > { %v753_v57 = vsel %vm470_vm7, %v751_v53, %v749_v52  ;;  %v752_v58 = vsel %vm470_vm7, %v749_v52, %v751_v53 }
 0x26c   : > { %v767_v59 = vmul.f32 %v763_v47, %v753_v57  ;;  %1042 = vmatprep.subr.bf16.mxu1 %v1041_v54  ;;  %v766_v9 = vmul.f32 %v759_v56, %v752_v58 }
 0x26d   : > { %1044 = vmatpush1.bf16.msra.mxu1 %v1043_v55 }
 0x26e   : > { %814 = vmatprep.subr.mxu1 %v767_v59 }
 0x271   : > { %815 = vmatpush1.msra.mxu1 %v766_v9 }
 0x272   : > { %1005 = vmatmul.mubr.msk.f32.vlgmr.msra.gmra.mrb[0].mxu1 %vm515_vm8, %v770_v60 }
 0x273   : > { %v793_v61 = vpop.permute.xlu0 %792 }
 0x345   : > { %v864_v62 = vpop.f32.mrb[0].mxu1 }
 0x346   : > { %v865_v8 = vadd.f32 %v864_v62, %v793_v61  ;;  %v866_v63 = vpop.f32.mrb[1].mxu1 }
 0x347   : > { %v867_v7 = vadd.f32 %v866_v63, %v793_v61 }
 0x348   : > { %v869_v2 = vadd.f32 %v865_v8, %v1509_v0 }
 0x349   : > { %v870_v3 = vadd.f32 %v867_v7, %v1515_v1 }
 0x34a   : > { %871 = vst [vmem:[%s292_s7] sm:$0xff] %v869_v2 }
 0x34b   : > { %872 = vst [vmem:[%s292_s7 + $0x8] sm:$0xff] %v870_v3 }
 0x34c   : > { %1222 = shalt.err (!%p1219_p7)
}
 0x34d   : > { %s1223_s19 = scalar_lea.hbm %s1759_s12, 256  ;;  %s1227_s17 = scalar_lea.hbm %s1809_s6, 512 }
 0x34e   : > { %p1224_p10 = scmp.ne.s32.totalorder %s1759_s12, %s1223_s19  ;;  %p1228_p0 = scmp.lt.u32.totalorder %s1759_s12, %s1809_s6 }
 0x34f   : > { %p1229_p11 = scmp.lt.u32.totalorder %s1227_s17, %s1223_s19  ;;  %p1231_p2 = scmp.lt.u32.totalorder %s1223_s19, %s1759_s12 }
 0x350   : > { %p1225_p13 = pnand %p1224_p10, %p1449_p6 }
 0x351   : > { %p1230_p9 = por %p1229_p11, %p1228_p0 }
 0x352   : > { %p1226_p5 = pneg %p1225_p13 }
 0x353   : > { %p1232_p1 = por %p1231_p2, %p1230_p9 }
 0x355   : > { %p1233_p4 = pnand %p1232_p1, %p1226_p5 }
 0x357   : > { %1236 = shalt.err (!%p1233_p4)
}
 0x358   : > { %1055 = dma.vmem_to_hbm [thread:$0]  (%p1449_p6), %s1761_s15, 256, %s1759_s12, %s874_s25  }
 0x359 PF: > { %s900_s7 = sand.u32 1, %s1267_s21   ;;  %p1826_p8 = scmp.ne.s32.totalorder %s1815_s28, 0 }
 0x35a   : > { %p1827_p12 = scmp.ge.s32.totalorder %s1279_s24, 2  ;;  %s901_s8 = scalar_lea.sflag [#allocation5], %s900_s7 }
 0x35c   : > { %p1069_p3 = pnand %p1827_p12, %p1826_p8 }
 0x35e   : > { %1262 = dma.done.wait (!%p1069_p3), %s901_s8, 256  }
 0x35f   : > { %1264 = vsyncadd (!%p1069_p3), %s901_s8, 4294967040  ;;  %p20_p7 = scmp.ge.s32.totalorder %s1386_s11, 4   ;;  %s1828_s21 = smov %s1271_s22 }
 0x360   : > { %s1829_s22 = smov %s1275_s23  ;;  %s1830_s23 = smov %s1445_s10 }
 0x361   : > { %s1831_s24 = smov %s1386_s11  ;;  %22 = sbr.rel (!%p20_p7) target bundleno = 6 (0x6), region = 104 }
 0x368   :  { %906 = vsyncpa [#allocation4], 1 }
 0x369   :  { %908 = vsyncpa [#allocation4 + $0x1], 1 }
 0x36a   :  { %909 = vsyncpa [#allocation7], 1 }
 0x36b   :  { %910 = vsyncpa [#allocation5], 1 }
 0x36c   :  { %912 = vsyncpa [#allocation5 + $0x1], 1 }

</bundles_post_ra>
